<compile_context>
chip_gen: v6e
topology: v6e:2x2x1
jax: 0.10.0
libtpu: 0.0.40
codegen_flags: <defaults>
</compile_context>

<pallas_src>
import functools

import jax
import jax.numpy as jnp
import numpy as np
from jax.experimental import pallas as pl
from jax.experimental.pallas import tpu as pltpu


# ---------------------------------------------------------------------------
# Host-side (pure numpy): 7x7 "same" conv (2 -> 1 channels) expressed as a
# (2*S, S) block-Toeplitz matrix so the kernel runs it as ONE MXU matmul.
# Row index = c*S + s_in, column index = s_out  (cross-correlation, matching
# torch.nn.Conv2d / lax.conv_general_dilated).
# ---------------------------------------------------------------------------
def build_conv_toeplitz(wsp, H, W):
    wsp = np.asarray(wsp, np.float32)          # (1, 2, K, K)
    _, in_ch, K, _ = wsp.shape
    P = (K - 1) // 2
    S = H * W
    T = np.zeros((in_ch, S, S), np.float32)
    hh, ww = np.meshgrid(np.arange(H), np.arange(W), indexing="ij")
    s_out = (hh * W + ww).ravel()
    for c in range(in_ch):
        for kh in range(K):
            for kw in range(K):
                h_in = (hh + kh - P).ravel()
                w_in = (ww + kw - P).ravel()
                valid = (h_in >= 0) & (h_in < H) & (w_in >= 0) & (w_in < W)
                s_in = (h_in * W + w_in)[valid]
                T[c, s_in, s_out[valid]] = wsp[0, c, kh, kw]
    return T.reshape(in_ch * S, S)             # (2*S, S) float32 numpy


def prepare_cbam_params(params, H, W):
    """One-time parameter prep (hoisted off the call path): transpose the MLP
    weights for row-major matmuls, make biases row vectors, and build the
    bf16 Toeplitz conv matrix."""
    w1, b1, w2, b2, wsp, bsp = params
    hid, C = w1.shape
    t2d = jnp.asarray(build_conv_toeplitz(wsp, H, W), dtype=jnp.bfloat16)
    return (
        jnp.asarray(w1).T,                        # (C, hid)
        jnp.asarray(b1).reshape(1, hid),          # (1, hid)
        jnp.asarray(w2).T,                        # (hid, C)
        jnp.asarray(b2).reshape(1, C),            # (1, C)
        t2d,                                      # (2*S, S) bf16
        jnp.asarray(bsp, jnp.float32).reshape(-1),  # (1,) f32 (SMEM scalar)
    )


def _pick_batch_tile(B, max_tile=8):
    """Largest divisor of B that is <= max_tile while keeping >= 2 grid steps
    (so v7x's two TensorCores both get work)."""
    if B <= 1:
        return max(B, 1)
    target = min(max_tile, B // 2)
    for bt in range(target, 0, -1):
        if B % bt == 0:
            return bt
    return 1


# ---------------------------------------------------------------------------
# Fused CBAM kernel: Bt batch images per grid step, (Bt, C, S) lane-dense.
# ---------------------------------------------------------------------------
def cbam_fused_kernel(x_ref, w1t_ref, b1_ref, w2t_ref, b2_ref, t_ref, bsp_ref,
                      o_ref):
    x = x_ref[...].astype(jnp.float32)                 # (Bt, C, S)
    Bt = x.shape[0]

    # --- ChannelGate: global avg/max pool over spatial + shared MLP --------
    avg = jnp.mean(x, axis=2)                          # (Bt, C)  == F.avg_pool2d
    mx = jnp.max(x, axis=2)                            # (Bt, C)  == F.max_pool2d
    pooled = jnp.concatenate([avg, mx], axis=0)        # (2*Bt, C): one MLP pass

    h = jnp.dot(pooled, w1t_ref[...],
                preferred_element_type=jnp.float32) + b1_ref[...]
    h = jnp.maximum(h, 0.0)                            # ReLU
    att = jnp.dot(h, w2t_ref[...],
                  preferred_element_type=jnp.float32) + b2_ref[...]  # (2*Bt, C)

    scale_c = jax.nn.sigmoid(att[:Bt] + att[Bt:])      # (Bt, C)
    xc = x * scale_c[:, :, None]                       # (Bt, C, S), lane bcast

    # --- SpatialGate: ChannelPool(max, mean) -> 7x7 conv (Toeplitz matmul) --
    cmax = jnp.max(xc, axis=1)                         # (Bt, S)  torch order: max
    cmean = jnp.mean(xc, axis=1)                       # (Bt, S)  then mean
    pooled2 = jnp.concatenate([cmax, cmean], axis=1).astype(jnp.bfloat16)

    conv = (jnp.dot(pooled2, t_ref[...],               # bf16 x bf16 -> f32 acc
                    preferred_element_type=jnp.float32)
            + bsp_ref[0])                              # (Bt, S), SMEM scalar bias

    o_ref[...] = (xc * jax.nn.sigmoid(conv)[:, None, :]).astype(o_ref.dtype)


# ---------------------------------------------------------------------------
# Wrapper
# ---------------------------------------------------------------------------
def cbam_pallas(x, kernel_params):
    w1t, b1, w2t, b2, t2d, bsp = kernel_params
    B, C, H, W = x.shape
    S = H * W
    hid = w1t.shape[1]
    Bt = _pick_batch_tile(B)

    x2 = x.reshape(B, C, S)                            # lane-dense spatial view

    out2 = pl.pallas_call(
        cbam_fused_kernel,
        out_shape=jax.ShapeDtypeStruct((B, C, S), x.dtype),
        grid=(B // Bt,),
        in_specs=[
            pl.BlockSpec((Bt, C, S), lambda b: (b, 0, 0)),    # x  (Bt images)
            pl.BlockSpec((C, hid), lambda b: (0, 0)),         # w1^T
            pl.BlockSpec((1, hid), lambda b: (0, 0)),         # b1 (row)
            pl.BlockSpec((hid, C), lambda b: (0, 0)),         # w2^T
            pl.BlockSpec((1, C), lambda b: (0, 0)),           # b2 (row)
            pl.BlockSpec((2 * S, S), lambda b: (0, 0)),       # Toeplitz conv (bf16)
            pl.BlockSpec(memory_space=pltpu.MemorySpace.SMEM),  # conv bias scalar
        ],
        out_specs=pl.BlockSpec((Bt, C, S), lambda b: (b, 0, 0)),
        compiler_params=pltpu.CompilerParams(
            dimension_semantics=("parallel",)),        # v7x: split batch over TCs
    )(x2, w1t, b1, w2t, b2, t2d, bsp)
    return out2.reshape(B, C, H, W)


# ---------------------------------------------------------------------------
# Pure-JAX reference (mirrors the PyTorch forward) for a correctness check
# ---------------------------------------------------------------------------
def cbam_ref(x, params):
    w1, b1, w2, b2, wsp, bsp = params
    avg = x.mean(axis=(2, 3))                          # (B, C)
    mx = x.max(axis=(2, 3))                            # (B, C)

    def mlp(p):
        h = jnp.maximum(p @ w1.T + b1, 0.0)
        return h @ w2.T + b2

    scale_c = jax.nn.sigmoid(mlp(avg) + mlp(mx))[:, :, None, None]
    xc = x * scale_c
    comp = jnp.stack([xc.max(axis=1), xc.mean(axis=1)], axis=1)   # (B, 2, H, W)
    conv = jax.lax.conv_general_dilated(
        comp, wsp, window_strides=(1, 1), padding=((3, 3), (3, 3)),
        dimension_numbers=("NCHW", "OIHW", "NCHW")) + bsp[0]
    return xc * jax.nn.sigmoid(conv)


if __name__ == "__main__":
    B, C, H, W = 4, 32, 16, 16
    reduction_ratio = 16
    hid = C // reduction_ratio                         # = 2

    key = jax.random.PRNGKey(0)
    kx, k1, k2, k3, k4, k5, k6 = jax.random.split(key, 7)

    x = jax.random.normal(kx, (B, C, H, W), dtype=jnp.float32)

    # ChannelGate MLP params (PyTorch Linear convention: weight is (out, in))
    w1 = 0.2 * jax.random.normal(k1, (hid, C), jnp.float32)
    b1 = 0.1 * jax.random.normal(k2, (hid,), jnp.float32)
    w2 = 0.2 * jax.random.normal(k3, (C, hid), jnp.float32)
    b2 = 0.1 * jax.random.normal(k4, (C,), jnp.float32)
    # SpatialGate conv params: Conv2d(2, 1, kernel_size=7, padding=3, bias=True)
    wsp = 0.2 * jax.random.normal(k5, (1, 2, 7, 7), jnp.float32)
    bsp = 0.1 * jax.random.normal(k6, (1,), jnp.float32)

    params = (w1, b1, w2, b2, wsp, bsp)
    kparams = prepare_cbam_params(params, H, W)        # hoisted, one-time setup

    out = jax.block_until_ready(cbam_pallas(x, kparams))
    ref = jax.block_until_ready(cbam_ref(x, params))

    assert out.shape == x.shape
    # Tolerance: the Toeplitz conv runs in bf16 (weights + pooled activations,
    # f32 accumulate) while the reference conv is full f32; the 98-tap sum can
    # carry ~1e-2 absolute error after the sigmoid * xc.  Structural bugs are
    # O(1e-1..1), so 2e-2 still catches real errors with margin.
    if not jnp.allclose(out, ref, atol=2e-2, rtol=2e-2):
        raise AssertionError(
            f"mismatch vs reference, max abs err = {jnp.max(jnp.abs(out - ref))}")
    print("KERNEL_OK")
</pallas_src>

<mosaic_0001>
module attributes {stable_mosaic.version = 11 : i64} {
  func.func @cbam_fused_kernel(%arg0: i32, %arg1: memref<2x32x256xf32, #tpu.memory_space<vmem>>, %arg2: memref<32x2xf32, #tpu.memory_space<vmem>>, %arg3: memref<1x2xf32, #tpu.memory_space<vmem>>, %arg4: memref<2x32xf32, #tpu.memory_space<vmem>>, %arg5: memref<1x32xf32, #tpu.memory_space<vmem>>, %arg6: memref<512x256xbf16, #tpu.memory_space<vmem>>, %arg7: memref<1xf32, #tpu.memory_space<smem>>, %arg8: memref<2x32x256xf32, #tpu.memory_space<vmem>>) attributes {dimension_semantics = [#tpu.dimension_semantics<parallel>], iteration_bounds = array<i64: 2>, scalar_prefetch = 0 : i64, scratch_operands = 0 : i64, tpu.core_type = #tpu.core_type<tc>, window_params = [{transform_indices = @transform_0, window_bounds = array<i64: 2, 32, 256>}, {pipeline_mode = #tpu.pipeline_mode<synchronous>, transform_indices = @transform_1, window_bounds = array<i64: 32, 2>}, {pipeline_mode = #tpu.pipeline_mode<synchronous>, transform_indices = @transform_2, window_bounds = array<i64: 1, 2>}, {pipeline_mode = #tpu.pipeline_mode<synchronous>, transform_indices = @transform_3, window_bounds = array<i64: 2, 32>}, {pipeline_mode = #tpu.pipeline_mode<synchronous>, transform_indices = @transform_4, window_bounds = array<i64: 1, 32>}, {pipeline_mode = #tpu.pipeline_mode<synchronous>, transform_indices = @transform_5, window_bounds = array<i64: 512, 256>}, {transform_indices = @transform_6, window_bounds = array<i64: 1>}, {transform_indices = @transform_7, window_bounds = array<i64: 2, 32, 256>}]} {
    %c0 = arith.constant 0 : index
    %c0_0 = arith.constant 0 : index
    %c0_1 = arith.constant 0 : index
    %0 = vector.load %arg1[%c0, %c0_0, %c0_1] : memref<2x32x256xf32, #tpu.memory_space<vmem>>, vector<2x32x256xf32>
    %cst = arith.constant dense<0.000000e+00> : vector<2x32xf32>
    %1 = vector.multi_reduction <add>, %0, %cst [2] : vector<2x32x256xf32> to vector<2x32xf32>
    %cst_2 = arith.constant 2.560000e+02 : f32
    %2 = vector.broadcast %cst_2 : f32 to vector<2x32xf32>
    %3 = arith.divf %1, %2 : vector<2x32xf32>
    %cst_3 = arith.constant dense<0xFF800000> : vector<2x32xf32>
    %4 = vector.multi_reduction <maximumf>, %0, %cst_3 [2] : vector<2x32x256xf32> to vector<2x32xf32>
    %5 = tpu.concatenate %3, %4 in 0 : vector<2x32xf32>, vector<2x32xf32> -> vector<4x32xf32>
    %c0_4 = arith.constant 0 : index
    %c0_5 = arith.constant 0 : index
    %6 = vector.load %arg2[%c0_4, %c0_5] : memref<32x2xf32, #tpu.memory_space<vmem>>, vector<32x2xf32>
    %cst_6 = arith.constant dense<0.000000e+00> : vector<4x2xf32>
    %7 = tpu.matmul %5, %6, %cst_6 {dimension_numbers = #tpu.dot_dimension_numbers<[1], [0], [0], [1], [0, 0, 1, 1], [], []>} : vector<4x32xf32>, vector<32x2xf32>, vector<4x2xf32> -> vector<4x2xf32>
    %c0_7 = arith.constant 0 : index
    %c0_8 = arith.constant 0 : index
    %8 = vector.load %arg3[%c0_7, %c0_8] : memref<1x2xf32, #tpu.memory_space<vmem>>, vector<1x2xf32>
    %9 = vector.broadcast %8 : vector<1x2xf32> to vector<4x2xf32>
    %10 = arith.addf %7, %9 : vector<4x2xf32>
    %cst_9 = arith.constant 0.000000e+00 : f32
    %11 = vector.broadcast %cst_9 : f32 to vector<4x2xf32>
    %12 = arith.maximumf %10, %11 : vector<4x2xf32>
    %c0_10 = arith.constant 0 : index
    %c0_11 = arith.constant 0 : index
    %13 = vector.load %arg4[%c0_10, %c0_11] : memref<2x32xf32, #tpu.memory_space<vmem>>, vector<2x32xf32>
    %cst_12 = arith.constant dense<0.000000e+00> : vector<4x32xf32>
    %14 = tpu.matmul %12, %13, %cst_12 {dimension_numbers = #tpu.dot_dimension_numbers<[1], [0], [0], [1], [0, 0, 1, 1], [], []>} : vector<4x2xf32>, vector<2x32xf32>, vector<4x32xf32> -> vector<4x32xf32>
    %c0_13 = arith.constant 0 : index
    %c0_14 = arith.constant 0 : index
    %15 = vector.load %arg5[%c0_13, %c0_14] : memref<1x32xf32, #tpu.memory_space<vmem>>, vector<1x32xf32>
    %16 = vector.broadcast %15 : vector<1x32xf32> to vector<4x32xf32>
    %17 = arith.addf %14, %16 : vector<4x32xf32>
    %18 = vector.extract_strided_slice %17 {offsets = [0, 0], sizes = [2, 32], strides = [1, 1]} : vector<4x32xf32> to vector<2x32xf32>
    %19 = vector.extract_strided_slice %17 {offsets = [2, 0], sizes = [2, 32], strides = [1, 1]} : vector<4x32xf32> to vector<2x32xf32>
    %20 = arith.addf %18, %19 : vector<2x32xf32>
    %21 = arith.negf %20 : vector<2x32xf32>
    %22 = math.exp %21 : vector<2x32xf32>
    %cst_15 = arith.constant 1.000000e+00 : f32
    %23 = vector.broadcast %cst_15 : f32 to vector<2x32xf32>
    %24 = arith.addf %23, %22 : vector<2x32xf32>
    %25 = arith.divf %23, %24 : vector<2x32xf32>
    %26 = vector.shape_cast %25 : vector<2x32xf32> to vector<2x32x1xf32>
    %27 = vector.broadcast %26 : vector<2x32x1xf32> to vector<2x32x256xf32>
    %28 = arith.mulf %0, %27 : vector<2x32x256xf32>
    %cst_16 = arith.constant dense<0xFF800000> : vector<2x256xf32>
    %29 = vector.multi_reduction <maximumf>, %28, %cst_16 [1] : vector<2x32x256xf32> to vector<2x256xf32>
    %cst_17 = arith.constant dense<0.000000e+00> : vector<2x256xf32>
    %30 = vector.multi_reduction <add>, %28, %cst_17 [1] : vector<2x32x256xf32> to vector<2x256xf32>
    %cst_18 = arith.constant 3.200000e+01 : f32
    %31 = vector.broadcast %cst_18 : f32 to vector<2x256xf32>
    %32 = arith.divf %30, %31 : vector<2x256xf32>
    %33 = tpu.concatenate %29, %32 in 1 : vector<2x256xf32>, vector<2x256xf32> -> vector<2x512xf32>
    %34 = arith.truncf %33 : vector<2x512xf32> to vector<2x512xbf16>
    %c0_19 = arith.constant 0 : index
    %c0_20 = arith.constant 0 : index
    %35 = vector.load %arg6[%c0_19, %c0_20] : memref<512x256xbf16, #tpu.memory_space<vmem>>, vector<512x256xbf16>
    %cst_21 = arith.constant dense<0.000000e+00> : vector<2x256xf32>
    %36 = tpu.matmul %34, %35, %cst_21 {dimension_numbers = #tpu.dot_dimension_numbers<[1], [0], [0], [1], [0, 0, 1, 1], [], []>} : vector<2x512xbf16>, vector<512x256xbf16>, vector<2x256xf32> -> vector<2x256xf32>
    %c0_22 = arith.constant 0 : index
    %37 = memref.load %arg7[%c0_22] : memref<1xf32, #tpu.memory_space<smem>>
    %38 = vector.broadcast %37 : f32 to vector<2x256xf32>
    %39 = arith.addf %36, %38 : vector<2x256xf32>
    %40 = arith.negf %39 : vector<2x256xf32>
    %41 = math.exp %40 : vector<2x256xf32>
    %cst_23 = arith.constant 1.000000e+00 : f32
    %42 = vector.broadcast %cst_23 : f32 to vector<2x256xf32>
    %43 = arith.addf %42, %41 : vector<2x256xf32>
    %44 = arith.divf %42, %43 : vector<2x256xf32>
    %45 = vector.shape_cast %44 : vector<2x256xf32> to vector<2x1x256xf32>
    %46 = vector.broadcast %45 : vector<2x1x256xf32> to vector<2x32x256xf32>
    %47 = arith.mulf %28, %46 : vector<2x32x256xf32>
    %c0_24 = arith.constant 0 : index
    %c0_25 = arith.constant 0 : index
    %c0_26 = arith.constant 0 : index
    %48 = vector.load %arg8[%c0_24, %c0_25, %c0_26] : memref<2x32x256xf32, #tpu.memory_space<vmem>>, vector<2x32x256xf32>
    tpu.vector_store %arg8[%c0_24, %c0_25, %c0_26], %47 {strides = array<i32>} : memref<2x32x256xf32, #tpu.memory_space<vmem>>, vector<2x32x256xf32>,
    return
  }
  func.func @transform_0(%arg0: i32) -> (i32, i32, i32) {
    %c0_i32 = arith.constant 0 : i32
    %c0_i32_0 = arith.constant 0 : i32
    %c0_i32_1 = arith.constant 0 : i32
    return %arg0, %c0_i32, %c0_i32_0 : i32, i32, i32
  }
  func.func @transform_1(%arg0: i32) -> (i32, i32) {
    %c0_i32 = arith.constant 0 : i32
    %c0_i32_0 = arith.constant 0 : i32
    %c0_i32_1 = arith.constant 0 : i32
    return %c0_i32, %c0_i32_0 : i32, i32
  }
  func.func @transform_2(%arg0: i32) -> (i32, i32) {
    %c0_i32 = arith.constant 0 : i32
    %c0_i32_0 = arith.constant 0 : i32
    %c0_i32_1 = arith.constant 0 : i32
    return %c0_i32, %c0_i32_0 : i32, i32
  }
  func.func @transform_3(%arg0: i32) -> (i32, i32) {
    %c0_i32 = arith.constant 0 : i32
    %c0_i32_0 = arith.constant 0 : i32
    %c0_i32_1 = arith.constant 0 : i32
    return %c0_i32, %c0_i32_0 : i32, i32
  }
  func.func @transform_4(%arg0: i32) -> (i32, i32) {
    %c0_i32 = arith.constant 0 : i32
    %c0_i32_0 = arith.constant 0 : i32
    %c0_i32_1 = arith.constant 0 : i32
    return %c0_i32, %c0_i32_0 : i32, i32
  }
  func.func @transform_5(%arg0: i32) -> (i32, i32) {
    %c0_i32 = arith.constant 0 : i32
    %c0_i32_0 = arith.constant 0 : i32
    %c0_i32_1 = arith.constant 0 : i32
    return %c0_i32, %c0_i32_0 : i32, i32
  }
  func.func @transform_6(%arg0: i32) -> i32 {
    %c0_i32 = arith.constant 0 : i32
    %c0_i32_0 = arith.constant 0 : i32
    return %c0_i32 : i32
  }
  func.func @transform_7(%arg0: i32) -> (i32, i32, i32) {
    %c0_i32 = arith.constant 0 : i32
    %c0_i32_0 = arith.constant 0 : i32
    %c0_i32_1 = arith.constant 0 : i32
    return %arg0, %c0_i32, %c0_i32_0 : i32, i32, i32
  }
}

</mosaic_0001>

<bundles_post_ra>
// kernel: tpu_custom_call.1
= control target key start
LH: loop header
LB: loop body
LE: loop exit
PB: predicated region body
PF: predicated region fallthrough
CT: control target
= control target key end

     0   :  { %s2372_s0 = inlined_call_operand.hbm [shape: f32[4,32,256], index: 0, kind: input, shape index: {}]   ;;  %s2373_s1 = inlined_call_operand.vmem [shape: f32[32,2], index: 1, kind: input, shape index: {}]   ;;  %s2374_s2 = inlined_call_operand.vmem [shape: f32[1,2], index: 2, kind: input, shape index: {}]   ;;  %s2375_s3 = inlined_call_operand.vmem [shape: f32[2,32], index: 3, kind: input, shape index: {}]   ;;  %s2376_s4 = inlined_call_operand.vmem [shape: f32[1,32], index: 4, kind: input, shape index: {}]   ;;  %s2377_s5 = inlined_call_operand.hbm [shape: bf16[512,256], index: 5, kind: input, shape index: {}]   ;;  %s2378_s6 = inlined_call_operand.<no memory space> [shape: f32[1], index: 6, kind: input, shape index: {}]   ;;  %s2379_s7 = inlined_call_operand.hbm [shape: f32[4,32,256], index: 7, kind: output, shape index: {}]  }
   0x1   :  { %12 = sst [smem:[#allocation2]] %s2378_s6 }
   0x2   :  { %13 = vsyncpa [#allocation4], 0 }
   0x3   :  { %15 = vsyncpa [#allocation4 + $0x1], 0 }
   0x4   :  { %16 = vsyncpa [#allocation7], 0 }
   0x5   :  { %17 = vsyncpa [#allocation5], 0 }
   0x6   :  { %19 = vsyncpa [#allocation5 + $0x1], 0  ;;  %s1954_s26 = smov 0   ;;  %s1956_s27 = smov 0  }
   0x7   :  { %s1958_s28 = smov 0   ;;  %s1960_s29 = smov 0  }
   0x8 LB: > { %s1975_s6 = sadd.s32 4294967295, %s1897_s29   ;;  %s1484_s30 = sadd.s32 4294967294, %s1897_s29   ;;  %s1897_s29 = sphi %s1960_s29, %s2401_s29   ;;  %s1893_s28 = sphi %s1958_s28, %s2400_s28   ;;  %s1889_s27 = sphi %s1956_s27, %s2399_s27   ;;  %s1885_s26 = sphi %s1954_s26, %s2398_s26  }
   0x9   : > { %p45_p0 = scmp.ne.s32.totalorder %s1889_s27, %s1885_s26  ;;  %p2380_p1 = scmp.eq.s32.totalorder %s1975_s6, 0 }
   0xa   : > { %p201_p3 = scmp.eq.s32.totalorder %s1484_s30, 1  ;;  %p1485_p5 = scmp.ge.s32.totalorder %s1897_s29, 1 }
   0xb   : > { %p1984_p4 = por %p2380_p1, %p45_p0  ;;  %p208_p7 = scmp.lt.s32.totalorder %s1897_s29, 3 }
   0xc   : > { %p1989_p6 = por %p201_p3, %p45_p0  ;;  %s1899_s11 = smov [#allocation6]  }
   0xd   : > { %s2384_s8 = scalar_select %p1984_p4, 1, 0 }
   0xe   : > { %s2385_s9 = scalar_select %p1989_p6, 1, 0 }
   0xf   : > { %p1994_p8 = pnand %p1485_p5, %p208_p7  ;;  %s232_s12 = sshll.u32 %s1899_s11, 4  ;;  %s233_s12 = int_to_ptr.vmem [resolvable:$true] %s232_s12 }
  0x10   : > { %s2008_s14 = sadd.s32 1, %s1897_s29   ;;  %s32_s15 = sadd.s32 1, %s1893_s28 }
  0x11   : > { %s2386_s10 = scalar_select %p1994_p8, 1, 0 }
  0x12   : > { %p1609_p9 = pneg %p1994_p8  ;;  %s29_s16 = ssub.s32 %s1897_s29, %s2008_s14 }
  0x13   : > { %s1786_s17 = scalar_lea.vmem %s233_s12, 8192  ;;  %p1794_p5 = scmp.lt.s32.totalorder %s233_s12, %s233_s12 }
  0x14   : > { %p2003_p11 = pnand %p1609_p9, %p2380_p1  ;;  %p1787_p13 = scmp.ne.s32.totalorder %s233_s12, %s1786_s17 }
  0x15   : > { %p1795_p7 = scmp.lt.s32.totalorder %s1786_s17, %s1786_s17 }
  0x16   : > { %p1777_p12 = pneg %p2003_p11 }
  0x17   : > { %p1796_p10 = por %p1795_p7, %p1794_p5 }
  0x18   : > { %p1789_p0 = pnand %p1787_p13, %p1777_p12 }
  0x1a   : > { %p1790_p3 = pneg %p1789_p0 }
  0x1c   : > { %p1797_p2 = pnand %p1796_p10, %p1790_p3 }
  0x1e   : > { %1800 = shalt.err (!%p1797_p2)
}
  0x1f   : > { %s1900_s18 = smov 128   ;;  %s1901_s19 = smov 8  }
  0x20   : > { %1612 = dma.hbm_to_vmem [thread:$0]  (!%p2003_p11), %s2377_s5, 8192, %s233_s12, [#allocation7], %s1900_s18, %s1900_s18, %s1901_s19  }
  0x21   : > { %p30_p9 = scmp.eq.s32.totalorder %s29_s16, 0  ;;  %p39_p12 = scmp.ne.s32.totalorder %s1893_s28, %s1889_s27 }
  0x22   : > { %p40_p10 = scmp.eq.s32.totalorder %s1897_s29, 0  ;;  %p1622_p2 = scmp.lt.s32.totalorder %s1897_s29, 2 }
  0x23   : > { %s2025_s22 = scalar_select %p30_p9, %s1893_s28, %s32_s15  }
  0x24   : > { %p41_p13 = por %p40_p10, %p39_p12  ;;  %p2388_p0 = scmp.eq.s32.totalorder %s1975_s6, 1 }
  0x25   : > { %s249_s24 = sand.u32 1, %s1893_s28   ;;  %s1575_s25 = sshll.u32 %s1897_s29, 11 }
  0x26   : > { %p2029_p3 = por %p2388_p0, %p39_p12  ;;  %s1488_s30 = sshll.u32 %s249_s24, 7 }
  0x27   : > { %s2038_s17 = scalar_lea.hbm %s2372_s0, %s1575_s25  ;;  %s253_s12 = scalar_lea.vmem [#allocation3], %s1488_s30 }
  0x28   : > { %s2389_s23 = scalar_select %p2029_p3, 1, 0 }
  0x29   : > { %s261_s15 = sshll.u32 %s253_s12, 4  ;;  %p2040_p11 = pnand %p1622_p2, %p41_p13  ;;  %s2044_s15 = int_to_ptr.vmem [resolvable:$true] %s261_s15 }
  0x2a   : > { %s2046_s18 = scalar_lea.sflag [#allocation4], %s249_s24  ;;  %s1801_s19 = scalar_lea.hbm %s2038_s17, 2048 }
  0x2b   : > { %p1802_p5 = scmp.ne.s32.totalorder %s2038_s17, %s1801_s19  ;;  %p1803_p7 = pneg %p2040_p11 }
  0x2c   : > { %s1806_s25 = scalar_lea.hbm %s2372_s0, 4096  ;;  %p1807_p10 = scmp.lt.s32.totalorder %s2038_s17, %s2372_s0 }
  0x2d   : > { %p1804_p9 = pnand %p1803_p7, %p1802_p5  ;;  %p1808_p2 = scmp.lt.s32.totalorder %s1806_s25, %s1801_s19 }
  0x2f   : > { %p1805_p12 = pneg %p1804_p9  ;;  %p1809_p13 = por %p1808_p2, %p1807_p10 }
  0x31   : > { %p1810_p0 = pnand %p1809_p13, %p1805_p12 }
  0x33   : > { %1813 = shalt.err (!%p1810_p0)
}
  0x34   : > { %s1814_s24 = scalar_lea.vmem %s2044_s15, 2048  ;;  %s1902_s13 = smov [#allocation3]  }
  0x35   : > { %p1815_p1 = scmp.ne.s32.totalorder %s2044_s15, %s1814_s24  ;;  %s1819_s12 = sshll.u32 %s1902_s13, 4  ;;  %s1820_s12 = int_to_ptr.vmem [resolvable:$false] %s1819_s12 }
  0x36   : > { %s1821_s20 = scalar_lea.vmem %s1820_s12, 4096  ;;  %p1822_p9 = scmp.lt.s32.totalorder %s2044_s15, %s1820_s12 }
  0x37   : > { %p1817_p6 = pnand %p1815_p1, %p1803_p7  ;;  %p1823_p3 = scmp.lt.s32.totalorder %s1821_s20, %s1814_s24 }
  0x39   : > { %p1818_p5 = pneg %p1817_p6  ;;  %p1824_p4 = por %p1823_p3, %p1822_p9 }
  0x3b   : > { %p1825_p8 = pnand %p1824_p4, %p1818_p5 }
  0x3d   : > { %1828 = shalt.err (!%p1825_p8)
}
  0x3e   : > { %s1903_s19 = smov 256   ;;  %s1904_s21 = smov 16  }
  0x3f   : > { %1616 = dma.hbm_to_vmem [thread:$0]  (!%p2040_p11), %s2038_s17, 2048, %s2044_s15, %s2046_s18, %s1903_s19, %s1903_s19, %s1904_s21  }
  0x40   : > { %p2391_p1 = scmp.ne.s32.totalorder %s2386_s10, 0 }
  0x41   : > { %s2070_s25 = sand.u32 (!%p2391_p1), 1, %s1889_s27   ;;  %p2392_p4 = scmp.ne.s32.totalorder (!%p2391_p1), %s2384_s8, 0 }
  0x42   : > { %273 = sbr.rel (%p2391_p1) target bundleno = 1094 (0x446), region = 48  ;;  %s1493_s30 = sshll.u32 (!%p2391_p1), %s2070_s25, 7 }
  0x43   : > { %s276_s11 = scalar_lea.sflag (!%p2391_p1), [#allocation4], %s2070_s25  ;;  %s279_s24 = scalar_lea.vmem (!%p2391_p1), [#allocation3], %s1493_s30 }
  0x47   : > { %1872 = dma.done.wait (%p2392_p4), %s276_s11, 2048  }
  0x48   : > { %1874 = vsyncadd (%p2392_p4), %s276_s11, 4294965248  ;;  %p2393_p6 = scmp.eq.s32.totalorder %s1975_s6, 0 }
  0x4a   : > { %1876 = dma.done.wait (%p2393_p6), [#allocation7], 8192   ;;  %p2394_p8 = pmov %p2393_p6 }
  0x4b   : > { %v2084_v0 = vld [vmem:[%s279_s24 + $0x40] sm:$0xff]  ;;  %v2086_v1 = vld [vmem:[%s279_s24 + $0x48] sm:$0xff]  ;;  %v2094_v5 = vld [vmem:[%s279_s24 + $0x50] sm:$0xff]  ;;  %v1905_v32 = vmov 0.0   ;;  %vm1906_vm0 = vmmov 0   ;;  %v397_v42 = vlaneseq  ;;  %vm408_vm1 = vcmask 130112  }
  0x4c   : > { %1878 = vsyncadd (%p2394_p8), [#allocation7], 4294959104  ;;  %v2088_v2 = vld [vmem:[%s279_s24] sm:$0xff]  ;;  %v344_v3 = vadd.f32 %v2086_v1, %v2084_v0  ;;  %v2092_v4 = vld [vmem:[%s279_s24 + $0x8] sm:$0xff]  ;;  %v377_v27 = vmax.f32 %v2084_v0, %v2086_v1  ;;  %1585 = vmatprep.subr.mxu0 %v1905_v32  ;;  %1596 = vmatprep.subr.mxu1 %v1905_v32  ;;  %vm415_vm2 = vcmask 195712   ;;  %vm422_vm3 = vcmask 261312  }
  0x4d   : > { %v2096_v6 = vld [vmem:[%s279_s24 + $0x58] sm:$0xff]  ;;  %v332_v7 = vadd.f32 %v2092_v4, %v2088_v2  ;;  %v2100_v8 = vld [vmem:[%s279_s24 + $0x10] sm:$0xff]  ;;  %v2108_v12 = vld [vmem:[%s279_s24 + $0x60] sm:$0xff]  ;;  %v365_v25 = vmax.f32 %v2088_v2, %v2092_v4  ;;  %1593 = vmatprep.mubr.msk.f32.mxu0 %vm1906_vm0, %v1905_v32  ;;  %1598 = vmatprep.mubr.msk.f32.mxu1 %vm1906_vm0, %v1905_v32  ;;  %v398_v45 = vand.u32 127, %v397_v42  ;;  %v2160_v47 = vshrl.u32 %v397_v42, 7  ;;  %s893_s10 = sld [smem:[#allocation2]] }
  0x4e   : > { %v2102_v9 = vld [vmem:[%s279_s24 + $0x18] sm:$0xff]  ;;  %345 = vadd.xlane.f32.xlu1 %v344_v3  ;;  %v347_v10 = vadd.f32 %v2096_v6, %v2094_v5  ;;  %v2110_v13 = vld [vmem:[%s279_s24 + $0x68] sm:$0xff]  ;;  %v2112_v14 = vld [vmem:[%s279_s24 + $0x20] sm:$0xff]  ;;  %v380_v26 = vmax.f32 %v2094_v5, %v2096_v6  ;;  %vm443_vm4 = vcmask 1041409   ;;  %vm492_vm5 = vcmask 1043459   ;;  %s1577_s17 = sshll.u32 %s1975_s6, 11 }
  0x4f   : > { %333 = vadd.xlane.f32.xlu0 %v332_v7  ;;  %v335_v11 = vadd.f32 %v2102_v9, %v2100_v8  ;;  %v2114_v15 = vld [vmem:[%s279_s24 + $0x28] sm:$0xff]  ;;  %v2116_v16 = vld [vmem:[%s279_s24 + $0x70] sm:$0xff]  ;;  %v2118_v17 = vld [vmem:[%s279_s24 + $0x78] sm:$0xff]  ;;  %v350_v18 = vadd.f32 %v2110_v13, %v2108_v12  ;;  %v368_v24 = vmax.f32 %v2100_v8, %v2102_v9  ;;  %v383_v28 = vmax.f32 %v2108_v12, %v2110_v13  ;;  %s2291_s15 = scalar_lea.vmem [#allocation8], %s1493_s30  ;;  %s2315_s18 = scalar_lea.hbm %s2379_s7, %s1577_s17 }
  0x50   : > { %v2122_v19 = vld [vmem:[%s279_s24 + $0x30] sm:$0xff]  ;;  %v2124_v20 = vld [vmem:[%s279_s24 + $0x38] sm:$0xff]  ;;  %v338_v21 = vadd.f32 %v2114_v15, %v2112_v14  ;;  %v353_v22 = vadd.f32 %v2118_v17, %v2116_v16  ;;  %v371_v29 = vmax.f32 %v2112_v14, %v2114_v15  ;;  %v386_v30 = vmax.f32 %v2116_v16, %v2118_v17  ;;  %v498_v35 = vld [vmem:[%s2373_s1 + $0x8] sm:$0xff]  ;;  %s1401_s16 = sshll.u32 %s2291_s15, 4  ;;  %s1387_s13 = scalar_lea.sflag [#allocation5], %s2070_s25  ;;  %s2317_s16 = int_to_ptr.vmem [resolvable:$true] %s1401_s16 }
  0x51   : > { %v341_v23 = vadd.f32 %v2124_v20, %v2122_v19  ;;  %v374_v31 = vmax.f32 %v2122_v19, %v2124_v20  ;;  %v500_v33 = vld [vmem:[%s2373_s1 + $0x18] sm:$0xff]  ;;  %v499_v34 = vld [vmem:[%s2373_s1 + $0x10] sm:$0xff]  ;;  %v497_v36 = vld [vmem:[%s2373_s1] sm:$0xff]  ;;  %v403_v48 = vadd.s32 4294967288, %v398_v45  ;;  %v410_v49 = vadd.s32 4294967280, %v398_v45  ;;  %s1829_s12 = scalar_lea.vmem %s2317_s16, 2048 }
  0x52   : > { %348 = vadd.xlane.f32.xlu1 %v347_v10  ;;  %1586 = vmatpush3.msra.mxu0 %v500_v33  ;;  %v417_v51 = vadd.s32 4294967272, %v398_v45  ;;  %v401_v53 = vsub.s32 %v398_v45, %v2160_v47  ;;  %vm495_vm6 = vcmask 1041408   ;;  %vm508_vm7 = vcmask 261120   ;;  %p1830_p3 = scmp.ne.s32.totalorder %s2317_s16, %s1829_s12  ;;  %p2395_p11 = scmp.ne.s32.totalorder %s2389_s23, 0 }
  0x53   : > { %336 = vadd.xlane.f32.xlu0 %v335_v11  ;;  %1587 = vmatprep.subr.mxu0 %v1905_v32  ;;  %v406_v54 = vsub.s32 %v403_v48, %v2160_v47  ;;  %v413_v56 = vsub.s32 %v410_v49, %v2160_v47  ;;  %vm591_vm8 = vcmask 15360   ;;  %s1908_s20 = smov [#allocation8]  }
  0x54   : > { %1588 = vmatpush3.msra.mxu0 %v499_v34  ;;  %v420_v63 = vsub.s32 %v417_v51, %v2160_v47  ;;  %p1831_p7 = pnand %p1830_p3, %p2395_p11  ;;  %s1833_s19 = sshll.u32 %s1908_s20, 4  ;;  %s1834_s19 = int_to_ptr.vmem [resolvable:$false] %s1833_s19 }
  0x55   : > { %1589 = vmatprep.subr.mxu0 %v1905_v32  ;;  %s1835_s21 = scalar_lea.vmem %s1834_s19, 4096  ;;  %p1836_p10 = scmp.lt.s32.totalorder %s2317_s16, %s1834_s19 }
  0x56   : > { %351 = vadd.xlane.f32.xlu1 %v350_v18  ;;  %1590 = vmatpush3.msra.mxu0 %v498_v35  ;;  %p1832_p12 = pneg %p1831_p7  ;;  %p1837_p2 = scmp.lt.s32.totalorder %s1835_s21, %s1829_s12 }
  0x57   : > { %339 = vadd.xlane.f32.xlu0 %v338_v21  ;;  %1591 = vmatprep.subr.mxu0 %v1905_v32 }
  0x58   : > { %1592 = vmatpush3.msra.mxu0 %v497_v36  ;;  %p1838_p13 = por %p1837_p2, %p1836_p10 }
  0x5a   : > { %354 = vadd.xlane.f32.xlu1 %v353_v22  ;;  %p1839_p0 = pnand %p1838_p13, %p1832_p12 }
  0x5b   : > { %342 = vadd.xlane.f32.xlu0 %v341_v23 }
  0x5e   : > { %369 = vmax.xlane.f32.xlu1 %v368_v24 }
  0x5f   : > { %366 = vmax.xlane.f32.xlu0 %v365_v25 }
  0x62   : > { %381 = vmax.xlane.f32.xlu1 %v380_v26 }
  0x63   : > { %378 = vmax.xlane.f32.xlu0 %v377_v27 }
  0x66   : > { %384 = vmax.xlane.f32.xlu1 %v383_v28 }
  0x67   : > { %372 = vmax.xlane.f32.xlu0 %v371_v29 }
  0x6a   : > { %387 = vmax.xlane.f32.xlu1 %v386_v30 }
  0x6b   : > { %375 = vmax.xlane.f32.xlu0 %v374_v31 }
  0xd7   : > { %v346_v37 = vpop.xlane.xlu1 %345 }
  0xd8   : > { %v334_v38 = vpop.xlane.xlu0 %333  ;;  %v361_v57 = vmul.f32 0.00390625, %v346_v37 }
  0xd9   : > { %v357_v58 = vmul.f32 0.00390625, %v334_v38 }
  0xda   : > { %v427_v18 = vrot.slane %v361_v57, %v401_v53 }
  0xdb   : > { %v349_v39 = vpop.xlane.xlu1 %348  ;;  %v402_v21 = vrot.slane %v357_v58, %v401_v53 }
  0xdc   : > { %v337_v40 = vpop.xlane.xlu0 %336  ;;  %v362_v55 = vmul.f32 0.00390625, %v349_v39 }
  0xdd   : > { %v358_v59 = vmul.f32 0.00390625, %v337_v40 }
  0xde   : > { %v431_v11 = vrot.slane %v362_v55, %v406_v54  ;;  %v583_v55 = vld [vmem:[%s2375_s3] sm:$0x3] }
  0xdf   : > { %v352_v41 = vpop.xlane.xlu1 %351  ;;  %v407_v22 = vrot.slane %v358_v59, %v406_v54  ;;  %1597 = vmatpush3.msk.msra.mxu1 %vm495_vm6, %v583_v55  ;;  %v1717_v55 = vld [vmem:[#allocation6 + $0xf4] ss:$8 sps:$4 sm:$0xff]  }
  0xe0   : > { %v340_v43 = vpop.xlane.xlu0 %339  ;;  %v363_v60 = vmul.f32 0.00390625, %v352_v41  ;;  %v432_v34 = vsel %vm408_vm1, %v431_v11, %v427_v18  ;;  %v1673_v11 = vld [vmem:[#allocation6 + $0x60] ss:$8 sps:$4 sm:$0xff]  }
  0xe1   : > { %v359_v62 = vmul.f32 0.00390625, %v340_v43  ;;  %v409_v36 = vsel %vm408_vm1, %v407_v22, %v402_v21  ;;  %v1676_v18 = vld [vmem:[#allocation6 + $0x160] ss:$8 sps:$4 sm:$0xff]   ;;  %v1681_v21 = vld [vmem:[#allocation6 + $0x54] ss:$8 sps:$4 sm:$0xff]  }
  0xe2   : > { %v436_v23 = vrot.slane %v363_v60, %v413_v56  ;;  %v1684_v22 = vld [vmem:[#allocation6 + $0x154] ss:$8 sps:$4 sm:$0xff]  }
  0xe3   : > { %v355_v44 = vpop.xlane.xlu1 %354  ;;  %v414_v25 = vrot.slane %v359_v62, %v413_v56  ;;  %v1669_v62 = vld [vmem:[#allocation6 + $0x74] ss:$8 sps:$4 sm:$0xff]  }
  0xe4   : > { %v343_v46 = vpop.xlane.xlu0 %342  ;;  %v364_v3 = vmul.f32 0.00390625, %v355_v44  ;;  %v437_v37 = vsel %vm415_vm2, %v436_v23, %v432_v34  ;;  %1215 = vmatprep.subr.bf16.mxu1 %v1669_v62  ;;  %v1679_v23 = vld [vmem:[#allocation6 + $0x50] ss:$8 sps:$4 sm:$0xff]   ;;  %v1702_v34 = vld [vmem:[#allocation6 + $0x124] ss:$8 sps:$4 sm:$0xff]  }
  0xe5   : > { %v360_v10 = vmul.f32 0.00390625, %v343_v46  ;;  %v416_v39 = vsel %vm415_vm2, %v414_v25, %v409_v36  ;;  %v1687_v25 = vld [vmem:[#allocation6 + $0x44] ss:$8 sps:$4 sm:$0xff]   ;;  %v1700_v36 = vld [vmem:[#allocation6 + $0x120] ss:$8 sps:$4 sm:$0xff]  }
  0xe6   : > { %v441_v26 = vrot.slane %v364_v3, %v420_v63  ;;  %v1672_v3 = vld [vmem:[#allocation6 + $0x174] ss:$8 sps:$4 sm:$0xff]   ;;  %v1726_v62 = vld [vmem:[#allocation6 + $0x1e4] ss:$8 sps:$4 sm:$0xff]  }
  0xe7   : > { %v370_v50 = vpop.xlane.xlu1 %369  ;;  %v421_v30 = vrot.slane %v360_v10, %v420_v63  ;;  %v1678_v10 = vld [vmem:[#allocation6 + $0x164] ss:$8 sps:$4 sm:$0xff]   ;;  %1256 = vmatprep.subr.bf16.mxu0 %v1672_v3  ;;  %v1724_v3 = vld [vmem:[#allocation6 + $0x1e0] ss:$8 sps:$4 sm:$0xff]  }
  0xe8   : > { %v367_v52 = vpop.xlane.xlu0 %366  ;;  %v461_v31 = vrot.slane %v370_v50, %v406_v54  ;;  %v442_v40 = vsel %vm422_vm3, %v441_v26, %v437_v37  ;;  %v1690_v26 = vld [vmem:[#allocation6 + $0x144] ss:$8 sps:$4 sm:$0xff]   ;;  %v1705_v37 = vld [vmem:[#allocation6 + $0x14] ss:$8 sps:$4 sm:$0xff]  }
  0xe9   : > { %v457_v32 = vrot.slane %v367_v52, %v401_v53  ;;  %v423_v44 = vsel %vm422_vm3, %v421_v30, %v416_v39  ;;  %v1696_v30 = vld [vmem:[#allocation6 + $0x134] ss:$8 sps:$4 sm:$0xff]   ;;  %v1703_v39 = vld [vmem:[#allocation6 + $0x10] ss:$8 sps:$4 sm:$0xff]  }
  0xea   : > { %v444_v52 = vsel %vm443_vm4, %v442_v40, %v423_v44  ;;  %v1706_v40 = vld [vmem:[#allocation6 + $0x110] ss:$8 sps:$4 sm:$0xff]  }
  0xeb   : > { %v382_v61 = vpop.xlane.xlu1 %381  ;;  %v462_v45 = vsel %vm408_vm1, %v461_v31, %v457_v32  ;;  %v1691_v31 = vld [vmem:[#allocation6 + $0x30] ss:$8 sps:$4 sm:$0xff]  }
  0xec   : > { %v379_v7 = vpop.xlane.xlu0 %378  ;;  %v480_v27 = vrot.slane %v382_v61, %v406_v54  ;;  %v1667_v61 = vld [vmem:[#allocation6 + $0x70] ss:$8 sps:$4 sm:$0xff]  }
  0xed   : > { %v476_v28 = vrot.slane %v379_v7, %v401_v53  ;;  %v1675_v7 = vld [vmem:[#allocation6 + $0x64] ss:$8 sps:$4 sm:$0xff]   ;;  %v1694_v32 = vld [vmem:[#allocation6 + $0x130] ss:$8 sps:$4 sm:$0xff]  }
  0xef   : > { %v385_v24 = vpop.xlane.xlu1 %384  ;;  %v481_v41 = vsel %vm408_vm1, %v480_v27, %v476_v28  ;;  %v1685_v27 = vld [vmem:[#allocation6 + $0x40] ss:$8 sps:$4 sm:$0xff]  }
  0xf0   : > { %v373_v29 = vpop.xlane.xlu0 %372  ;;  %v485_v33 = vrot.slane %v385_v24, %v413_v56  ;;  %v1682_v24 = vld [vmem:[#allocation6 + $0x150] ss:$8 sps:$4 sm:$0xff]   ;;  %v1688_v28 = vld [vmem:[#allocation6 + $0x140] ss:$8 sps:$4 sm:$0xff]  }
  0xf1   : > { %v466_v35 = vrot.slane %v373_v29, %v413_v56  ;;  %v1496_v56 = vld [vmem:[%s2374_s2] ss:$0 sm:$0xff]  ;;  %v1693_v29 = vld [vmem:[#allocation6 + $0x34] ss:$8 sps:$4 sm:$0xff]  }
  0xf2   : > { %v486_v46 = vsel %vm415_vm2, %v485_v33, %v481_v41  ;;  %v1699_v33 = vld [vmem:[#allocation6 + $0x24] ss:$8 sps:$4 sm:$0xff]   ;;  %v1498_v41 = vld [vmem:[%s2376_s4] ss:$0 sm:$0xff] }
  0xf3   : > { %v388_v38 = vpop.xlane.xlu1 %387  ;;  %v467_v49 = vsel %vm415_vm2, %v466_v35, %v462_v45  ;;  %v1697_v35 = vld [vmem:[#allocation6 + $0x20] ss:$8 sps:$4 sm:$0xff]  }
  0xf4   : > { %v490_v42 = vrot.slane %v388_v38, %v420_v63  ;;  %v376_v43 = vpop.xlane.xlu0 %375  ;;  %v1708_v38 = vld [vmem:[#allocation6 + $0x114] ss:$8 sps:$4 sm:$0xff]  }
  0xf5   : > { %v471_v48 = vrot.slane %v376_v43, %v420_v63  ;;  %v1670_v63 = vld [vmem:[#allocation6 + $0x170] ss:$8 sps:$4 sm:$0xff]  }
  0xf6   : > { %v491_v50 = vsel %vm422_vm3, %v490_v42, %v486_v46 }
  0xf7   : > { %v472_v51 = vsel %vm422_vm3, %v471_v48, %v467_v49 }
  0xf8   : > { %v493_v53 = vsel %vm492_vm5, %v491_v50, %v472_v51  ;;  %v1711_v51 = vld [vmem:[#allocation6 + $0x4] ss:$8 sps:$4 sm:$0xff]  }
  0xf9   : > { %v496_v54 = vsel %vm495_vm6, %v444_v52, %v493_v53  ;;  %v1709_v52 = vld [vmem:[#allocation6] ss:$8 sps:$4 sm:$0xff]   ;;  %v1714_v53 = vld [vmem:[#allocation6 + $0x104] ss:$8 sps:$4 sm:$0xff]  }
  0xfa   : > { %1594 = vmatmul.mubr.msk.f32.vlgmr.msra.gmra.mxu0 %vm508_vm7, %v496_v54  ;;  %v1712_v54 = vld [vmem:[#allocation6 + $0x100] ss:$8 sps:$4 sm:$0xff]  }
  0xfb   : > { %1257 = vmatpush1.bf16.msra.mxu0 %v1670_v63 }
  0xfc   : > { %1258 = vmatprep.subr.bf16.mxu0 %v1678_v10  ;;  %v2194_v10 = vsub.s32 1, %v2160_v47 }
  0xff   : > { %1259 = vmatpush1.bf16.msra.mxu0 %v1676_v18  ;;  %v1727_v18 = vld [vmem:[#allocation6 + $0xd0] ss:$8 sps:$4 sm:$0xff]  }
 0x100   : > { %1260 = vmatprep.subr.bf16.mxu0 %v1684_v22  ;;  %v1730_v22 = vld [vmem:[#allocation6 + $0x1d0] ss:$8 sps:$4 sm:$0xff]  }
 0x103   : > { %1261 = vmatpush1.bf16.msra.mxu0 %v1682_v24  ;;  %v1735_v24 = vld [vmem:[#allocation6 + $0xc4] ss:$8 sps:$4 sm:$0xff]  }
 0x104   : > { %1262 = vmatprep.subr.bf16.mxu0 %v1690_v26  ;;  %v1738_v26 = vld [vmem:[#allocation6 + $0x1c4] ss:$8 sps:$4 sm:$0xff]  }
 0x107   : > { %1263 = vmatpush1.bf16.msra.mxu0 %v1688_v28  ;;  %v1741_v28 = vld [vmem:[#allocation6 + $0xb4] ss:$8 sps:$4 sm:$0xff]  }
 0x108   : > { %1264 = vmatprep.subr.bf16.mxu0 %v1696_v30  ;;  %v1744_v30 = vld [vmem:[#allocation6 + $0x1b4] ss:$8 sps:$4 sm:$0xff]  }
 0x10b   : > { %1265 = vmatpush1.bf16.msra.mxu0 %v1694_v32  ;;  %v1747_v32 = vld [vmem:[#allocation6 + $0xa4] ss:$8 sps:$4 sm:$0xff]  }
 0x10c   : > { %1266 = vmatprep.subr.bf16.mxu0 %v1702_v34  ;;  %v1750_v34 = vld [vmem:[#allocation6 + $0x1a4] ss:$8 sps:$4 sm:$0xff]  }
 0x10f   : > { %1267 = vmatpush1.bf16.msra.mxu0 %v1700_v36  ;;  %v1753_v36 = vld [vmem:[#allocation6 + $0x94] ss:$8 sps:$4 sm:$0xff]  }
 0x110   : > { %1268 = vmatprep.subr.bf16.mxu0 %v1708_v38  ;;  %v1756_v38 = vld [vmem:[#allocation6 + $0x194] ss:$8 sps:$4 sm:$0xff]  }
 0x113   : > { %1269 = vmatpush1.bf16.msra.mxu0 %v1706_v40  ;;  %v1759_v40 = vld [vmem:[#allocation6 + $0x84] ss:$8 sps:$4 sm:$0xff]  }
 0x114   : > { %1270 = vmatprep.subr.bf16.mxu0 %v1714_v53 }
 0x117   : > { %1271 = vmatpush1.bf16.msra.mxu0 %v1712_v54 }
 0x1ba   : > { %v578_v57 = vpop.f32.mrf.mxu0 }
 0x1bb   : > { %v579_v58 = vadd.f32 %v1496_v56, %v578_v57  ;;  %v1715_v56 = vld [vmem:[#allocation6 + $0xf0] ss:$8 sps:$4 sm:$0xff]   ;;  %v1720_v57 = vld [vmem:[#allocation6 + $0x1f4] ss:$8 sps:$4 sm:$0xff]  }
 0x1bc   : > { %v1595_v59 = vpop.f32.mrf.mxu0  ;;  %1272 = vmatprep.subr.bf16.mxu0 %v1720_v57 }
 0x1bd   : > { %v582_v60 = vmax.f32 %v579_v58, 0.0  ;;  %v1718_v58 = vld [vmem:[#allocation6 + $0x1f0] ss:$8 sps:$4 sm:$0xff]   ;;  %v2190_v59 = vsub.s32 0, %v2160_v47 }
 0x1be   : > { %1273 = vmatpush2.bf16.msra.mxu0 %v1718_v58 }
 0x1bf   : > { %1599 = vmatmul.mubr.msk.f32.vlgmr.msra.gmra.mxu1 %vm591_vm8, %v582_v60  ;;  %v1723_v60 = vld [vmem:[#allocation6 + $0xe4] ss:$8 sps:$4 sm:$0xff]   ;;  %1274 = vmatprep.subr.bf16.mxu0 %v1726_v62 }
 0x1c0   : > { %1216 = vmatpush1.bf16.msra.mxu1 %v1667_v61  ;;  %v1721_v61 = vld [vmem:[#allocation6 + $0xe0] ss:$8 sps:$4 sm:$0xff]  }
 0x1c1   : > { %1217 = vmatprep.subr.bf16.mxu1 %v1675_v7 }
 0x1c2   : > { %1275 = vmatpush2.bf16.msra.mxu0 %v1724_v3 }
 0x1c4   : > { %1218 = vmatpush1.bf16.msra.mxu1 %v1673_v11  ;;  %v1729_v11 = vld [vmem:[#allocation6 + $0xd4] ss:$8 sps:$4 sm:$0xff]  }
 0x1c5   : > { %1219 = vmatprep.subr.bf16.mxu1 %v1681_v21  ;;  %v1732_v21 = vld [vmem:[#allocation6 + $0x1d4] ss:$8 sps:$4 sm:$0xff]  }
 0x1c6   : > { %1276 = vmatprep.subr.bf16.mxu0 %v1732_v21 }
 0x1c7   : > { %1277 = vmatpush2.bf16.msra.mxu0 %v1730_v22 }
 0x1c8   : > { %1220 = vmatpush1.bf16.msra.mxu1 %v1679_v23  ;;  %1278 = vmatprep.subr.bf16.mxu0 %v1738_v26 }
 0x1c9   : > { %1221 = vmatprep.subr.bf16.mxu1 %v1687_v25  ;;  %v1733_v25 = vld [vmem:[#allocation6 + $0xc0] ss:$8 sps:$4 sm:$0xff]  }
 0x1cc   : > { %1222 = vmatpush1.bf16.msra.mxu1 %v1685_v27  ;;  %v1736_v27 = vld [vmem:[#allocation6 + $0x1c0] ss:$8 sps:$4 sm:$0xff]  }
 0x1cd   : > { %1223 = vmatprep.subr.bf16.mxu1 %v1693_v29  ;;  %1279 = vmatpush2.bf16.msra.mxu0 %v1736_v27  ;;  %v1739_v29 = vld [vmem:[#allocation6 + $0xb0] ss:$8 sps:$4 sm:$0xff]  }
 0x1ce   : > { %1280 = vmatprep.subr.bf16.mxu0 %v1744_v30 }
 0x1d0   : > { %1224 = vmatpush1.bf16.msra.mxu1 %v1691_v31  ;;  %v1742_v31 = vld [vmem:[#allocation6 + $0x1b0] ss:$8 sps:$4 sm:$0xff]  }
 0x1d1   : > { %1225 = vmatprep.subr.bf16.mxu1 %v1699_v33  ;;  %1281 = vmatpush2.bf16.msra.mxu0 %v1742_v31  ;;  %v1745_v33 = vld [vmem:[#allocation6 + $0xa0] ss:$8 sps:$4 sm:$0xff]  }
 0x1d2   : > { %1282 = vmatprep.subr.bf16.mxu0 %v1750_v34 }
 0x1d4   : > { %1226 = vmatpush1.bf16.msra.mxu1 %v1697_v35  ;;  %v1748_v35 = vld [vmem:[#allocation6 + $0x1a0] ss:$8 sps:$4 sm:$0xff]  }
 0x1d5   : > { %1227 = vmatprep.subr.bf16.mxu1 %v1705_v37  ;;  %1283 = vmatpush2.bf16.msra.mxu0 %v1748_v35  ;;  %v1751_v37 = vld [vmem:[#allocation6 + $0x90] ss:$8 sps:$4 sm:$0xff]  }
 0x1d6   : > { %1284 = vmatprep.subr.bf16.mxu0 %v1756_v38 }
 0x1d8   : > { %1228 = vmatpush1.bf16.msra.mxu1 %v1703_v39  ;;  %v1754_v39 = vld [vmem:[#allocation6 + $0x190] ss:$8 sps:$4 sm:$0xff]  }
 0x1d9   : > { %1229 = vmatprep.subr.bf16.mxu1 %v1711_v51  ;;  %1285 = vmatpush2.bf16.msra.mxu0 %v1754_v39 }
 0x1dc   : > { %1230 = vmatpush1.bf16.msra.mxu1 %v1709_v52 }
 0x1dd   : > { %1231 = vmatprep.subr.bf16.mxu1 %v1717_v55 }
 0x1e0   : > { %1232 = vmatpush2.bf16.msra.mxu1 %v1715_v56 }
 0x1e1   : > { %1233 = vmatprep.subr.bf16.mxu1 %v1723_v60 }
 0x1e4   : > { %1234 = vmatpush2.bf16.msra.mxu1 %v1721_v61 }
 0x1e5   : > { %1235 = vmatprep.subr.bf16.mxu1 %v1729_v11 }
 0x1e8   : > { %1236 = vmatpush2.bf16.msra.mxu1 %v1727_v18 }
 0x1e9   : > { %1237 = vmatprep.subr.bf16.mxu1 %v1735_v24 }
 0x1ec   : > { %1238 = vmatpush2.bf16.msra.mxu1 %v1733_v25 }
 0x1ed   : > { %1239 = vmatprep.subr.bf16.mxu1 %v1741_v28 }
 0x1f0   : > { %1240 = vmatpush2.bf16.msra.mxu1 %v1739_v29 }
 0x1f1   : > { %1241 = vmatprep.subr.bf16.mxu1 %v1747_v32 }
 0x1f4   : > { %1242 = vmatpush2.bf16.msra.mxu1 %v1745_v33 }
 0x1f5   : > { %1243 = vmatprep.subr.bf16.mxu1 %v1753_v36 }
 0x1f8   : > { %1244 = vmatpush2.bf16.msra.mxu1 %v1751_v37 }
 0x1f9   : > { %1245 = vmatprep.subr.bf16.mxu1 %v1759_v40 }
 0x27f   : > { %v664_v42 = vpop.f32.mrf.mxu1 }
 0x280   : > { %v665_v43 = vadd.f32 %v1498_v41, %v664_v42  ;;  %v1757_v41 = vld [vmem:[#allocation6 + $0x80] ss:$8 sps:$4 sm:$0xff]  }
 0x281   : > { %v1600_v44 = vpop.f32.mrf.mxu1  ;;  %v1760_v42 = vld [vmem:[#allocation6 + $0x180] ss:$8 sps:$4 sm:$0xff]   ;;  %1246 = vmatpush2.bf16.msra.mxu1 %v1757_v41 }
 0x282   : > { %v669_v45 = vrot.slane %v665_v43, 2 }
 0x284   : > { %v671_v46 = vadd.f32 %v669_v45, %v665_v43  ;;  %v1762_v43 = vld [vmem:[#allocation6 + $0x184] ss:$8 sps:$4 sm:$0xff]  }
 0x285   : > { %1286 = vmatprep.subr.bf16.mxu0 %v1762_v43 }
 0x286   : > { %v1501_v48 = vmul.f32 -1.442695, %v671_v46  ;;  %1287 = vmatpush2.bf16.msra.mxu0 %v1760_v42 }
 0x288   : > { %1763 = vpow2.f32 %v1501_v48 }
 0x295   : > { %v1764_v49 = vpop.eup %1763 }
 0x296   : > { %v675_v50 = vadd.f32 1.0, %v1764_v49 }
 0x298   : > { %1765 = vrcp.f32 %v675_v50 }
 0x2a5   : > { %v1766_v63 = vpop.eup %1765 }
 0x2a6   : > { %v681_v7 = vrot.slane %v1766_v63, %v2190_v59  ;;  %v700_v23 = vrot.slane %v1766_v63, %v2194_v10 }
 0x2a8   : > { %687 = vbcast.lane.b32.xlu1 %v681_v7, 264  ;;  %683 = vbcast.lane.b32.xlu0 %v681_v7, 256 }
 0x2ac   : > { %702 = vbcast.lane.b32.xlu1 %v700_v23, 256  ;;  %691 = vbcast.lane.b32.xlu0 %v681_v7, 272 }
 0x2b0   : > { %706 = vbcast.lane.b32.xlu1 %v700_v23, 264  ;;  %695 = vbcast.lane.b32.xlu0 %v681_v7, 280 }
 0x2b4   : > { %710 = vbcast.lane.b32.xlu1 %v700_v23, 272 }
 0x2b8   : > { %714 = vbcast.lane.b32.xlu1 %v700_v23, 280 }
 0x31a   : > { %v688_v44 = vpop.permute.xlu1 %687  ;;  %v684_v45 = vpop.permute.xlu0 %683 }
 0x31b   : > { %v2198_v46 = vmul.f32 %v688_v44, %v2100_v8  ;;  %v2201_v48 = vmul.f32 %v688_v44, %v2102_v9  ;;  %v2204_v49 = vmul.f32 %v684_v45, %v2088_v2  ;;  %v2207_v50 = vmul.f32 %v684_v45, %v2092_v4 }
 0x31d   : > { %v732_v8 = vmax.f32 %v2204_v49, %v2198_v46  ;;  %v741_v9 = vmax.f32 %v2207_v50, %v2201_v48  ;;  %v768_v2 = vadd.f32 %v2198_v46, %v2204_v49  ;;  %v777_v4 = vadd.f32 %v2201_v48, %v2207_v50 }
 0x31e   : > { %v703_v51 = vpop.permute.xlu1 %702  ;;  %v692_v52 = vpop.permute.xlu0 %691 }
 0x31f   : > { %v2210_v53 = vmul.f32 %v692_v52, %v2112_v14  ;;  %v2213_v54 = vmul.f32 %v692_v52, %v2114_v15 }
 0x321   : > { %v733_v60 = vmax.f32 %v732_v8, %v2210_v53  ;;  %v742_v61 = vmax.f32 %v741_v9, %v2213_v54  ;;  %v769_v62 = vadd.f32 %v768_v2, %v2210_v53  ;;  %v778_v63 = vadd.f32 %v777_v4, %v2213_v54 }
 0x322   : > { %v707_v55 = vpop.permute.xlu1 %706  ;;  %v696_v56 = vpop.permute.xlu0 %695 }
 0x323   : > { %v2224_v14 = vmul.f32 %v707_v55, %v2094_v5  ;;  %v2227_v15 = vmul.f32 %v707_v55, %v2096_v6  ;;  %v2230_v57 = vmul.f32 %v696_v56, %v2122_v19  ;;  %v2233_v58 = vmul.f32 %v696_v56, %v2124_v20 }
 0x324   : > { %v2240_v5 = vmul.f32 %v703_v51, %v2084_v0  ;;  %v2243_v6 = vmul.f32 %v703_v51, %v2086_v1 }
 0x325   : > { %v734_v19 = vmax.f32 %v733_v60, %v2230_v57  ;;  %v743_v3 = vmax.f32 %v742_v61, %v2233_v58  ;;  %v770_v20 = vadd.f32 %v769_v62, %v2230_v57  ;;  %v779_v7 = vadd.f32 %v778_v63, %v2233_v58 }
 0x326   : > { %v711_v11 = vpop.permute.xlu1 %710  ;;  %v750_v18 = vmax.f32 %v2240_v5, %v2224_v14  ;;  %v759_v21 = vmax.f32 %v2243_v6, %v2227_v15  ;;  %v786_v26 = vadd.f32 %v2224_v14, %v2240_v5  ;;  %v795_v27 = vadd.f32 %v2227_v15, %v2243_v6 }
 0x327   : > { %v2254_v0 = vmul.f32 %v711_v11, %v2108_v12  ;;  %v2257_v1 = vmul.f32 %v711_v11, %v2110_v13  ;;  %v735_v22 = vrot.slane %v734_v19, 4  ;;  %v744_v23 = vrot.slane %v743_v3, 4 }
 0x328   : > { %v771_v24 = vrot.slane %v770_v20, 4  ;;  %v780_v25 = vrot.slane %v779_v7, 4 }
 0x329   : > { %v751_v28 = vmax.f32 %v750_v18, %v2254_v0  ;;  %v760_v29 = vmax.f32 %v759_v21, %v2257_v1  ;;  %v736_v30 = vmax.f32 %v734_v19, %v735_v22  ;;  %v745_v12 = vmax.f32 %v743_v3, %v744_v23 }
 0x32a   : > { %v772_v31 = vadd.f32 %v771_v24, %v770_v20  ;;  %v781_v32 = vadd.f32 %v780_v25, %v779_v7  ;;  %v715_v13 = vpop.permute.xlu1 %714  ;;  %v787_v33 = vadd.f32 %v786_v26, %v2254_v0  ;;  %v796_v34 = vadd.f32 %v795_v27, %v2257_v1 }
 0x32b   : > { %v2268_v35 = vmul.f32 %v715_v13, %v2116_v16  ;;  %v2271_v36 = vmul.f32 %v715_v13, %v2118_v17  ;;  %v737_v37 = vrot.slane %v736_v30, 2  ;;  %v746_v38 = vrot.slane %v745_v12, 2 }
 0x32c   : > { %v773_v39 = vrot.slane %v772_v31, 2  ;;  %v782_v40 = vrot.slane %v781_v32, 2 }
 0x32d   : > { %v752_v41 = vmax.f32 %v751_v28, %v2268_v35  ;;  %v761_v42 = vmax.f32 %v760_v29, %v2271_v36  ;;  %v788_v43 = vadd.f32 %v787_v33, %v2268_v35  ;;  %v797_v44 = vadd.f32 %v796_v34, %v2271_v36 }
 0x32e   : > { %v774_v45 = vadd.f32 %v773_v39, %v772_v31  ;;  %v783_v51 = vadd.f32 %v782_v40, %v781_v32  ;;  %v738_v17 = vmax.f32 %v736_v30, %v737_v37  ;;  %v747_v2 = vmax.f32 %v745_v12, %v746_v38 }
 0x32f   : > { %v753_v52 = vrot.slane %v752_v41, 4  ;;  %v762_v16 = vrot.slane %v761_v42, 4  ;;  %v789_v8 = vrot.slane %v788_v43, 4  ;;  %v798_v9 = vrot.slane %v797_v44, 4 }
 0x330   : > { %v775_v61 = vrot.slane %v774_v45, 1  ;;  %v784_v62 = vrot.slane %v783_v51, 1  ;;  %v739_v7 = vrot.slane %v738_v17, 1  ;;  %v748_v11 = vrot.slane %v747_v2, 1 }
 0x331   : > { %v754_v4 = vmax.f32 %v752_v41, %v753_v52  ;;  %v763_v55 = vmax.f32 %v761_v42, %v762_v16  ;;  %v790_v56 = vadd.f32 %v789_v8, %v788_v43  ;;  %v799_v60 = vadd.f32 %v798_v9, %v797_v44 }
 0x332   : > { %v776_v24 = vadd.f32 %v775_v61, %v774_v45  ;;  %v785_v25 = vadd.f32 %v784_v62, %v783_v51  ;;  %v740_v30 = vmax.f32 %v738_v17, %v739_v7  ;;  %v749_v12 = vmax.f32 %v747_v2, %v748_v11 }
 0x333   : > { %v755_v63 = vrot.slane %v754_v4, 2  ;;  %v764_v19 = vrot.slane %v763_v55, 2  ;;  %v791_v3 = vrot.slane %v790_v56, 2  ;;  %v800_v20 = vrot.slane %v799_v60, 2 }
 0x334   : > { %v805_v34 = vmul.f32 0.03125, %v776_v24  ;;  %v806_v37 = vmul.f32 0.03125, %v785_v25  ;;  %v894_v16 = vstv %s893_s10 }
 0x335   : > { %v756_v18 = vmax.f32 %v754_v4, %v755_v63  ;;  %v765_v21 = vmax.f32 %v763_v55, %v764_v19  ;;  %v792_v22 = vadd.f32 %v791_v3, %v790_v56  ;;  %v801_v23 = vadd.f32 %v800_v20, %v799_v60 }
 0x337   : > { %v757_v26 = vrot.slane %v756_v18, 1  ;;  %v793_v27 = vrot.slane %v792_v22, 1  ;;  %v802_v28 = vrot.slane %v801_v23, 1  ;;  %v766_v29 = vrot.slane %v765_v21, 1 }
 0x339   : > { %v758_v31 = vmax.f32 %v756_v18, %v757_v26  ;;  %v794_v32 = vadd.f32 %v793_v27, %v792_v22  ;;  %v767_v13 = vmax.f32 %v765_v21, %v766_v29  ;;  %v803_v33 = vadd.f32 %v802_v28, %v801_v23 }
 0x33a   : > { %v1907_v22 = vmov 1966171168  }
 0x33b   : > { %v807_v38 = vmul.f32 0.03125, %v794_v32  ;;  %v814_v39 = vsel %vm443_vm4, %v767_v13, %v749_v12  ;;  %v813_v40 = vsel %vm443_vm4, %v758_v31, %v740_v30  ;;  %v808_v41 = vmul.f32 0.03125, %v803_v33 }
 0x33c   : > { %v826_v42 = vpack.c.bf16 %v814_v39, %v814_v39  ;;  %v825_v43 = vpack.c.bf16 %v813_v40, %v813_v40  ;;  %v1313_v23 = vunpack.c.l.s4 %v1907_v22 }
 0x33d   : > { %v822_v44 = vsel %vm443_vm4, %v808_v41, %v806_v37  ;;  %v821_v45 = vsel %vm443_vm4, %v807_v38, %v805_v34 }
 0x33e   : > { %1247 = vmatprep.mubr.bf16.mxu1 %v826_v42  ;;  %v828_v51 = vpack.c.bf16 %v822_v44, %v822_v44  ;;  %v827_v52 = vpack.c.bf16 %v821_v45, %v821_v45  ;;  %v1314_v24 = vunpack.c.0.s8 %v1313_v23 }
 0x33f   : > { %1248 = vmatmul.mubr.bf16.vlgmr.msra.gmra.mxu1 %v825_v43 }
 0x340   : > { %1288 = vmatprep.mubr.bf16.mxu0 %v828_v51  ;;  %v1317_v26 = vsub.s32 %v1314_v24, %v2160_v47 }
 0x341   : > { %1289 = vmatmul.mubr.bf16.vlgmr.msra.gmra.mxu0 %v827_v52 }
 0x3ff   : > { %v1249_v8 = vpop.f32.mrf.mxu1 }
 0x400   : > { %v1250_v9 = vadd.f32 %v1249_v8, %v894_v16 }
 0x401   : > { %v1251_v17 = vpop.f32.mrf.mxu1  ;;  %v1290_v2 = vpop.f32.mrf.mxu0 }
 0x402   : > { %v1252_v4 = vadd.f32 %v1251_v17, %v894_v16  ;;  %v1291_v55 = vadd.f32 %v1290_v2, %v1250_v9 }
 0x403   : > { %v1253_v56 = vpop.f32.mrf.mxu1  ;;  %v1292_v60 = vpop.f32.mrf.mxu0 }
 0x404   : > { %v1566_v61 = vmul.f32 -1.442695, %v1291_v55  ;;  %v1293_v62 = vadd.f32 %v1292_v60, %v1252_v4 }
 0x405   : > { %v1254_v63 = vpop.f32.mrf.mxu1  ;;  %v1294_v19 = vpop.f32.mrf.mxu0 }
 0x406   : > { %1767 = vpow2.f32 %v1566_v61  ;;  %v1567_v3 = vmul.f32 -1.442695, %v1293_v62 }
 0x407   : > { %v1295_v20 = vpop.f32.mrf.mxu0 }
 0x408   : > { %1769 = vpow2.f32 %v1567_v3 }
 0x413   : > { %v1768_v7 = vpop.eup %1767 }
 0x414   : > { %v1303_v11 = vadd.f32 1.0, %v1768_v7 }
 0x415   : > { %v1770_v18 = vpop.eup %1769 }
 0x416   : > { %v1304_v21 = vadd.f32 1.0, %v1770_v18  ;;  %1771 = vrcp.f32 %v1303_v11 }
 0x418   : > { %1773 = vrcp.f32 %v1304_v21 }
 0x423   : > { %v1772_v25 = vpop.eup %1771 }
 0x425   : > { %v1774_v27 = vpop.eup %1773 }
 0x426   : > { %v1311_v28 = vcombine.low %v1772_v25, %v1774_v27 }
 0x428   : > { %v1318_v29 = vrot.slane %v1311_v28, %v1317_v26 }
 0x42a   : > { %v1319_v30 = vcombine.high %v1318_v29, %v1318_v29  ;;  %v1326_v12 = vrot.slane %v1318_v29, %v1317_v26 }
 0x42c   : > { %v1333_v31 = vrot.slane %v1319_v30, %v1317_v26  ;;  %v1337_v32 = vrot.slane %v1326_v12, %v2190_v59  ;;  %v1341_v13 = vrot.slane %v1326_v12, %v2194_v10 }
 0x42e   : > { %v1345_v33 = vrot.slane %v1333_v31, %v2190_v59  ;;  %v1349_v34 = vrot.slane %v1333_v31, %v2194_v10  ;;  %v1354_v37 = vmul.f32 %v1337_v32, %v2204_v49  ;;  %v1355_v38 = vmul.f32 %v1341_v13, %v2207_v50 }
 0x42f   : > { %v1356_v47 = vmul.f32 %v1337_v32, %v2198_v46  ;;  %v1357_v59 = vmul.f32 %v1341_v13, %v2201_v48  ;;  %v1358_v10 = vmul.f32 %v1337_v32, %v2210_v53  ;;  %v1359_v49 = vmul.f32 %v1341_v13, %v2213_v54 }
 0x430   : > { %v1360_v50 = vmul.f32 %v1337_v32, %v2230_v57  ;;  %v1361_v39 = vmul.f32 %v1341_v13, %v2233_v58  ;;  %v1362_v40 = vmul.f32 %v1345_v33, %v2240_v5  ;;  %v1363_v41 = vmul.f32 %v1349_v34, %v2243_v6  ;;  %1370 = vst [vmem:[%s2291_s15] sm:$0xff] %v1354_v37 }
 0x431   : > { %1371 = vst [vmem:[%s2291_s15 + $0x8] sm:$0xff] %v1355_v38  ;;  %v1364_v46 = vmul.f32 %v1345_v33, %v2224_v14  ;;  %v1365_v48 = vmul.f32 %v1349_v34, %v2227_v15  ;;  %v1366_v53 = vmul.f32 %v1345_v33, %v2254_v0  ;;  %v1367_v54 = vmul.f32 %v1349_v34, %v2257_v1 }
 0x432   : > { %1372 = vst [vmem:[%s2291_s15 + $0x10] sm:$0xff] %v1356_v47  ;;  %1373 = vst [vmem:[%s2291_s15 + $0x18] sm:$0xff] %v1357_v59  ;;  %v1368_v14 = vmul.f32 %v1345_v33, %v2268_v35  ;;  %v1369_v15 = vmul.f32 %v1349_v34, %v2271_v36 }
 0x433   : > { %1374 = vst [vmem:[%s2291_s15 + $0x20] sm:$0xff] %v1358_v10  ;;  %1375 = vst [vmem:[%s2291_s15 + $0x28] sm:$0xff] %v1359_v49 }
 0x434   : > { %1376 = vst [vmem:[%s2291_s15 + $0x30] sm:$0xff] %v1360_v50  ;;  %1377 = vst [vmem:[%s2291_s15 + $0x38] sm:$0xff] %v1361_v39 }
 0x435   : > { %1378 = vst [vmem:[%s2291_s15 + $0x40] sm:$0xff] %v1362_v40  ;;  %1379 = vst [vmem:[%s2291_s15 + $0x48] sm:$0xff] %v1363_v41 }
 0x436   : > { %1380 = vst [vmem:[%s2291_s15 + $0x50] sm:$0xff] %v1364_v46  ;;  %1381 = vst [vmem:[%s2291_s15 + $0x58] sm:$0xff] %v1365_v48 }
 0x437   : > { %1382 = vst [vmem:[%s2291_s15 + $0x60] sm:$0xff] %v1366_v53  ;;  %1383 = vst [vmem:[%s2291_s15 + $0x68] sm:$0xff] %v1367_v54 }
 0x438   : > { %1384 = vst [vmem:[%s2291_s15 + $0x70] sm:$0xff] %v1368_v14  ;;  %1385 = vst [vmem:[%s2291_s15 + $0x78] sm:$0xff] %v1369_v15 }
 0x439   : > { %1842 = shalt.err (!%p1839_p0)
}
 0x43a   : > { %s1843_s11 = scalar_lea.hbm %s2315_s18, 2048  ;;  %s1847_s10 = scalar_lea.hbm %s2379_s7, 4096 }
 0x43b   : > { %p1844_p5 = scmp.ne.s32.totalorder %s2315_s18, %s1843_s11  ;;  %p1848_p4 = scmp.lt.s32.totalorder %s2315_s18, %s2379_s7 }
 0x43c   : > { %p1849_p6 = scmp.lt.s32.totalorder %s1847_s10, %s1843_s11 }
 0x43d   : > { %p1845_p9 = pnand %p1844_p5, %p2395_p11 }
 0x43e   : > { %p1850_p8 = por %p1849_p6, %p1848_p4 }
 0x43f   : > { %p1846_p1 = pneg %p1845_p9 }
 0x441   : > { %p1851_p3 = pnand %p1850_p8, %p1846_p1 }
 0x443   : > { %1854 = shalt.err (!%p1851_p3)
}
 0x444   : > { %s1909_s6 = smov 256   ;;  %s1910_s30 = smov 16  }
 0x445   : > { %1607 = dma.vmem_to_hbm [thread:$0]  (%p2395_p11), %s2317_s16, 2048, %s2315_s18, %s1387_s13, %s1909_s6, %s1909_s6, %s1910_s30  }
 0x446 PF: > { %s1416_s12 = sand.u32 1, %s1885_s26   ;;  %p2396_p7 = scmp.ne.s32.totalorder %s2385_s9, 0 }
 0x447   : > { %p2397_p12 = scmp.ge.s32.totalorder %s1897_s29, 2  ;;  %s1417_s20 = scalar_lea.sflag [#allocation5], %s1416_s12 }
 0x449   : > { %p1618_p10 = pnand %p2397_p12, %p2396_p7 }
 0x44b   : > { %p1619_p2 = pneg %p1618_p10 }
 0x44d   : > { %1880 = dma.done.wait (%p1619_p2), %s1417_s20, 2048  }
 0x44e   : > { %1882 = vsyncadd (%p1619_p2), %s1417_s20, 4294965248  ;;  %p22_p13 = scmp.ge.s32.totalorder %s2008_s14, 4   ;;  %s2398_s26 = smov %s1889_s27 }
 0x44f   : > { %s2399_s27 = smov %s1893_s28  ;;  %s2400_s28 = smov %s2025_s22 }
 0x450   : > { %s2401_s29 = smov %s2008_s14  ;;  %24 = sbr.rel (!%p22_p13) target bundleno = 8 (0x8), region = 97 }
 0x455   :  { %1422 = vsyncpa [#allocation4], 1 }
 0x456   :  { %1424 = vsyncpa [#allocation4 + $0x1], 1 }
 0x457   :  { %1425 = vsyncpa [#allocation7], 1 }
 0x458   :  { %1426 = vsyncpa [#allocation5], 1 }
 0x459   :  { %1428 = vsyncpa [#allocation5 + $0x1], 1 }

</bundles_post_ra>
